<compile_context>
chip_gen: v7x
topology: tpu7x:2x2x1
jax: 0.10.0
libtpu: 0.0.40
codegen_flags: <defaults>
</compile_context>

<pallas_src>
import functools

import jax
import jax.numpy as jnp
from jax.experimental import pallas as pl
from jax.experimental.pallas import tpu as pltpu

DEFAULT_SPATIAL_WEIGHTS = (1.0, 2.0, 5.0, 10.0, 30.0)
DEFAULT_THRESHOLDS = (20.0, 30.0, 40.0, 50.0, 80.0)
DEFAULT_TIME_WEIGHT_GAP = 1

_TARGET_BLOCK_BYTES = 8 * 1024 * 1024   # per input; x2 inputs x2 buffers = 32 MiB
_VMEM_LIMIT_BYTES = 48 * 1024 * 1024    # explicit scoped-VMEM request


def _collapse_cascade(spatial_weights, thresholds):
    """Trace-time simulation of the sequential in-place masked assignments.

    Returns pieces ((upper_0, c_0), (upper_1, c_1), ...) with ascending upper
    bounds: original values v < upper_0 map to c_0, upper_0 <= v < upper_1 map
    to c_1, ..., and v >= upper_last keep their own value.  This is exactly the
    function computed by the PyTorch loop (including later passes re-testing
    previously assigned constants), folded at trace time.
    """
    const_pieces = []            # [lo, hi, value], ascending, contiguous from -inf
    id_lo = float("-inf")        # identity piece is [id_lo, +inf)
    for thr, wt in zip(thresholds, spatial_weights):
        thr = float(thr)
        wt = float(wt)
        # In-place semantics: previously assigned constants get re-tested.
        const_pieces = [[lo, hi, wt if val < thr else val]
                        for lo, hi, val in const_pieces]
        # Chop the (rightmost) identity piece.
        if thr > id_lo:
            const_pieces.append([id_lo, thr, wt])
            id_lo = thr
    merged = []                  # merge adjacent equal-constant pieces
    for _lo, hi, val in const_pieces:
        if merged and merged[-1][1] == val:
            merged[-1][0] = hi
        else:
            merged.append([hi, val])
    return tuple((hi, val) for hi, val in merged)


def _sublane_multiple(dtype):
    itemsize = jnp.dtype(dtype).itemsize
    return max(8, 32 // max(1, itemsize))    # f32->8, bf16->16, int8/fp8->32


def _vmem_limit_bytes():
    limit = _VMEM_LIMIT_BYTES
    try:  # clamp to 3/4 of physical VMEM when the query is available
        cap = int(pltpu.get_tpu_info().vmem_capacity_bytes)
        limit = min(limit, (cap * 3) // 4)
    except Exception:
        pass
    return max(limit, 4 * 1024 * 1024)


def _pick_blocks(total_rows, p, itemsize, sublane, target):
    """Choose (rows_per_block, lane_block) aiming for ~`target` bytes/block."""
    row_bytes = p * itemsize
    if total_rows * row_bytes <= target:          # whole problem in one block
        return total_rows, p
    min_rows = min(sublane, total_rows)
    if min_rows * row_bytes <= target:            # tile rows only, full-width lanes
        rows = max(min_rows, (target // row_bytes) // sublane * sublane)
        return int(min(rows, total_rows)), p
    # Huge frames: also tile the lane (H*W) axis with a multiple of 128 that
    # divides p, so no ragged-lane masking is ever needed.
    rows = min_rows
    if p % 128 == 0:
        limit = max(128, target // (rows * itemsize))
        q = p // 128
        m = min(q, int(limit) // 128)
        while m > 1 and q % m != 0:
            m -= 1
        return rows, m * 128
    # TODO(synk): ragged lane tiling for H*W not a multiple of 128.
    return rows, p


def _stbmae_kernel(tw_ref, yp_ref, yt_ref, out_ref, *,
                   pieces, rows_per_block, total_rows, mask_rows):
    yp = yp_ref[...].astype(jnp.float32)
    yt = yt_ref[...].astype(jnp.float32)

    # Collapsed spatial-weight cascade, evaluated on the original y_true value.
    w = yt
    for upper, const in reversed(pieces):
        w = jnp.where(yt < jnp.float32(upper), jnp.float32(const), w)

    # Per-row lane reduction (XLU), then the per-row time weight.
    row_sums = jnp.sum(w * jnp.abs(yp - yt), axis=-1, keepdims=True)   # (R, 1)
    contrib = row_sums * tw_ref[...].astype(jnp.float32)               # (R, 1)

    if mask_rows:  # ragged last row-block: per-row mask, not per-element
        row0 = pl.program_id(0) * rows_per_block
        rows = row0 + jax.lax.broadcasted_iota(jnp.int32, contrib.shape, 0)
        contrib = jnp.where(rows < total_rows, contrib, jnp.float32(0.0))

    # One partial sum per grid step (no carried accumulator -> parallel grid).
    out_ref[0, 0] = jnp.sum(contrib)


def stbmae_loss(y_pre, y_true,
                spatial_weights=DEFAULT_SPATIAL_WEIGHTS,
                thresholds=DEFAULT_THRESHOLDS,
                time_weight_gap=DEFAULT_TIME_WEIGHT_GAP,
                block_bytes=None):
    """Pallas TPU implementation of STBMAELoss.forward -> scalar f32."""
    assert y_pre.shape == y_true.shape
    assert len(spatial_weights) == len(thresholds)

    if y_true.ndim == 5:
        batch, seq, channel, height, width = y_true.shape
        assert channel == 1
    elif y_true.ndim == 4:
        batch, seq, height, width = y_true.shape
    else:
        raise ValueError("STBMAELoss expects a 4D or 5D tensor")

    scale = max(thresholds)
    thresholds_norm = tuple(float(t) / float(scale) for t in thresholds)
    pieces = _collapse_cascade(tuple(float(w) for w in spatial_weights),
                               thresholds_norm)

    p = height * width
    total_rows = batch * seq
    # Free, contiguous reshapes (no HBM copy): row index = b*S + s.
    yp2d = y_pre.reshape(total_rows, p)
    yt2d = y_true.reshape(total_rows, p)

    # Per-row time weight: tw[b*S + s] = s * gap + 1 (applied per-row in-kernel).
    tw = jnp.arange(seq, dtype=jnp.float32) * jnp.float32(float(time_weight_gap)) + 1.0
    tw_rows = jnp.tile(tw, batch).reshape(total_rows, 1)

    vmem_limit = _vmem_limit_bytes()
    target = block_bytes if block_bytes is not None else min(_TARGET_BLOCK_BYTES,
                                                             vmem_limit // 6)
    itemsize = jnp.dtype(y_pre.dtype).itemsize
    sublane = _sublane_multiple(y_pre.dtype)
    rows_per_block, lane_block = _pick_blocks(total_rows, p, itemsize, sublane, target)
    num_row_blocks = -(-total_rows // rows_per_block)
    num_lane_blocks = -(-p // lane_block)
    mask_rows = (total_rows % rows_per_block) != 0

    kernel = functools.partial(
        _stbmae_kernel,
        pieces=pieces,
        rows_per_block=rows_per_block,
        total_rows=total_rows,
        mask_rows=mask_rows,
    )

    n_elem = total_rows * p
    cost = pl.CostEstimate(
        flops=(2 * len(pieces) + 4) * n_elem,
        transcendentals=0,
        bytes_accessed=(2 * n_elem * int(itemsize) + total_rows * 4
                        + num_row_blocks * num_lane_blocks * 4),
    )

    partial_sums = pl.pallas_call(
        kernel,
        out_shape=jax.ShapeDtypeStruct((num_row_blocks, num_lane_blocks), jnp.float32),
        grid_spec=pltpu.PrefetchScalarGridSpec(
            num_scalar_prefetch=0,
            grid=(num_row_blocks, num_lane_blocks),
            in_specs=[
                pl.BlockSpec((rows_per_block, 1), lambda i, j: (i, 0)),
                pl.BlockSpec((rows_per_block, lane_block), lambda i, j: (i, j)),
                pl.BlockSpec((rows_per_block, lane_block), lambda i, j: (i, j)),
            ],
            out_specs=pl.BlockSpec((1, 1), lambda i, j: (i, j),
                                   memory_space=pltpu.SMEM),
        ),
        compiler_params=pltpu.CompilerParams(
            dimension_semantics=("parallel", "parallel"),
            vmem_limit_bytes=vmem_limit),
        cost_estimate=cost,
    )(tw_rows, yp2d, yt2d)

    inv_count = jnp.float32(1.0 / float(batch * p))
    return jnp.sum(partial_sums) * inv_count


def _stbmae_loss_ref(y_pre, y_true,
                     spatial_weights=DEFAULT_SPATIAL_WEIGHTS,
                     thresholds=DEFAULT_THRESHOLDS,
                     time_weight_gap=DEFAULT_TIME_WEIGHT_GAP):
    """Pure-JAX reference: literal replay of the PyTorch forward."""
    scale = max(thresholds)
    thresholds_norm = tuple(float(t) / float(scale) for t in thresholds)
    w = y_true.astype(jnp.float32)
    for thr, wt in zip(thresholds_norm, spatial_weights):
        w = jnp.where(w < jnp.float32(thr), jnp.float32(wt), w)
    diff = jnp.abs(y_pre.astype(jnp.float32) - y_true.astype(jnp.float32))
    seq = y_true.shape[1]
    total = jnp.float32(0.0)
    for i in range(seq):
        tw_i = i * time_weight_gap + 1
        total = total + jnp.float32(tw_i) * jnp.mean(w[:, i] * diff[:, i])
    return total


if __name__ == "__main__":
    key = jax.random.PRNGKey(0)
    k1, k2, k3, k4 = jax.random.split(key, 4)

    # 1) Main 4D case (batch, seq, height, width); y_true lies in [0, 1].
    shape = (2, 8, 16, 16)
    y_true = jax.random.uniform(k1, shape, dtype=jnp.float32)
    y_pre = y_true + 0.1 * jax.random.normal(k2, shape, dtype=jnp.float32)
    loss = jax.block_until_ready(stbmae_loss(y_pre, y_true))
    ref = jax.block_until_ready(_stbmae_loss_ref(y_pre, y_true))
    assert jnp.allclose(loss, ref, rtol=1e-5, atol=1e-5), (loss, ref)

    # 2) 5D input exercising the multi-row-block + ragged-last-block path.
    shape5 = (3, 5, 1, 16, 16)
    yt5 = jax.random.uniform(k3, shape5, dtype=jnp.float32)
    yp5 = yt5 + 0.1 * jax.random.normal(k4, shape5, dtype=jnp.float32)
    loss5 = jax.block_until_ready(stbmae_loss(yp5, yt5, block_bytes=8 * 1024))
    ref5 = jax.block_until_ready(_stbmae_loss_ref(yp5, yt5))
    assert jnp.allclose(loss5, ref5, rtol=1e-5, atol=1e-5), (loss5, ref5)

    # 3) bf16 inputs exercising the lane-tiled (second grid axis) path.
    yt_bf = y_true.astype(jnp.bfloat16)
    yp_bf = y_pre.astype(jnp.bfloat16)
    loss_bf = jax.block_until_ready(stbmae_loss(yp_bf, yt_bf, block_bytes=4 * 1024))
    ref_bf = jax.block_until_ready(_stbmae_loss_ref(yp_bf, yt_bf))
    assert jnp.allclose(loss_bf, ref_bf, rtol=1e-4, atol=1e-4), (loss_bf, ref_bf)

    print("KERNEL_OK")
</pallas_src>

<mosaic_0001>
module attributes {stable_mosaic.version = 11 : i64} {
  func.func @_stbmae_kernel(%arg0: i32, %arg1: i32, %arg2: memref<16x1xf32, #tpu.memory_space<vmem>>, %arg3: memref<16x256xf32, #tpu.memory_space<vmem>>, %arg4: memref<16x256xf32, #tpu.memory_space<vmem>>, %arg5: memref<1x1xf32, #tpu.memory_space<smem>>) attributes {dimension_semantics = [#tpu.dimension_semantics<parallel>, #tpu.dimension_semantics<parallel>], iteration_bounds = array<i64: 1, 1>, scalar_prefetch = 0 : i64, scratch_operands = 0 : i64, tpu.core_type = #tpu.core_type<tc>, window_params = [{transform_indices = @transform_0, window_bounds = array<i64: 16, 1>}, {transform_indices = @transform_1, window_bounds = array<i64: 16, 256>}, {transform_indices = @transform_2, window_bounds = array<i64: 16, 256>}, {transform_indices = @transform_3, window_bounds = array<i64: 1, 1>}]} {
    %c0 = arith.constant 0 : index
    %c0_0 = arith.constant 0 : index
    %0 = vector.load %arg3[%c0, %c0_0] : memref<16x256xf32, #tpu.memory_space<vmem>>, vector<16x256xf32>
    %c0_1 = arith.constant 0 : index
    %c0_2 = arith.constant 0 : index
    %1 = vector.load %arg4[%c0_1, %c0_2] : memref<16x256xf32, #tpu.memory_space<vmem>>, vector<16x256xf32>
    %cst = arith.constant 1.000000e+00 : f32
    %2 = vector.broadcast %cst : f32 to vector<16x256xf32>
    %3 = arith.cmpf olt, %1, %2 : vector<16x256xf32>
    %cst_3 = arith.constant 3.000000e+01 : f32
    %4 = vector.broadcast %cst_3 : f32 to vector<16x256xf32>
    %5 = arith.select %3, %4, %1 : vector<16x256xi1>, vector<16x256xf32>
    %cst_4 = arith.constant 6.250000e-01 : f32
    %6 = vector.broadcast %cst_4 : f32 to vector<16x256xf32>
    %7 = arith.cmpf olt, %1, %6 : vector<16x256xf32>
    %cst_5 = arith.constant 1.000000e+01 : f32
    %8 = vector.broadcast %cst_5 : f32 to vector<16x256xf32>
    %9 = arith.select %7, %8, %5 : vector<16x256xi1>, vector<16x256xf32>
    %cst_6 = arith.constant 5.000000e-01 : f32
    %10 = vector.broadcast %cst_6 : f32 to vector<16x256xf32>
    %11 = arith.cmpf olt, %1, %10 : vector<16x256xf32>
    %cst_7 = arith.constant 5.000000e+00 : f32
    %12 = vector.broadcast %cst_7 : f32 to vector<16x256xf32>
    %13 = arith.select %11, %12, %9 : vector<16x256xi1>, vector<16x256xf32>
    %cst_8 = arith.constant 3.750000e-01 : f32
    %14 = vector.broadcast %cst_8 : f32 to vector<16x256xf32>
    %15 = arith.cmpf olt, %1, %14 : vector<16x256xf32>
    %cst_9 = arith.constant 2.000000e+00 : f32
    %16 = vector.broadcast %cst_9 : f32 to vector<16x256xf32>
    %17 = arith.select %15, %16, %13 : vector<16x256xi1>, vector<16x256xf32>
    %cst_10 = arith.constant 2.500000e-01 : f32
    %18 = vector.broadcast %cst_10 : f32 to vector<16x256xf32>
    %19 = arith.cmpf olt, %1, %18 : vector<16x256xf32>
    %cst_11 = arith.constant 1.000000e+00 : f32
    %20 = vector.broadcast %cst_11 : f32 to vector<16x256xf32>
    %21 = arith.select %19, %20, %17 : vector<16x256xi1>, vector<16x256xf32>
    %22 = arith.subf %0, %1 : vector<16x256xf32>
    %23 = math.absf %22 : vector<16x256xf32>
    %24 = arith.mulf %21, %23 : vector<16x256xf32>
    %cst_12 = arith.constant dense<0.000000e+00> : vector<16xf32>
    %25 = vector.multi_reduction <add>, %24, %cst_12 [1] : vector<16x256xf32> to vector<16xf32>
    %26 = vector.shape_cast %25 : vector<16xf32> to vector<16x1xf32>
    %c0_13 = arith.constant 0 : index
    %c0_14 = arith.constant 0 : index
    %27 = vector.load %arg2[%c0_13, %c0_14] : memref<16x1xf32, #tpu.memory_space<vmem>>, vector<16x1xf32>
    %28 = arith.mulf %26, %27 : vector<16x1xf32>
    %29 = vector.shape_cast %28 : vector<16x1xf32> to vector<1x16x1xf32>
    %cst_15 = arith.constant dense<0.000000e+00> : vector<1xf32>
    %30 = vector.multi_reduction <add>, %29, %cst_15 [1, 2] : vector<1x16x1xf32> to vector<1xf32>
    %31 = vector.shape_cast %30 : vector<1xf32> to vector<1x1x1xf32>
    %32 = vector.extract %31[0, 0, 0] : f32 from vector<1x1x1xf32>
    %c0_16 = arith.constant 0 : index
    %c0_17 = arith.constant 0 : index
    %33 = memref.load %arg5[%c0_16, %c0_17] : memref<1x1xf32, #tpu.memory_space<smem>>
    memref.store %32, %arg5[%c0_16, %c0_17] : memref<1x1xf32, #tpu.memory_space<smem>>
    return
  }
  func.func @transform_0(%arg0: i32, %arg1: i32) -> (i32, i32) {
    %c0_i32 = arith.constant 0 : i32
    %c0_i32_0 = arith.constant 0 : i32
    return %arg0, %c0_i32 : i32, i32
  }
  func.func @transform_1(%arg0: i32, %arg1: i32) -> (i32, i32) {
    %c0_i32 = arith.constant 0 : i32
    return %arg0, %arg1 : i32, i32
  }
  func.func @transform_2(%arg0: i32, %arg1: i32) -> (i32, i32) {
    %c0_i32 = arith.constant 0 : i32
    return %arg0, %arg1 : i32, i32
  }
  func.func @transform_3(%arg0: i32, %arg1: i32) -> (i32, i32) {
    %c0_i32 = arith.constant 0 : i32
    return %arg0, %arg1 : i32, i32
  }
}

</mosaic_0001>

<bundles_post_ra>
// kernel: tpu_custom_call.1
= control target key start
LH: loop header
LB: loop body
LE: loop exit
PB: predicated region body
PF: predicated region fallthrough
CT: control target
= control target key end

     0   :  { %8 = vsyncpa [#allocation3], 0  ;;  %s278_s0 = inlined_call_operand.vmem [shape: f32[16,1], index: 0, kind: input, shape index: {}]   ;;  %s279_s1 = inlined_call_operand.hbm [shape: f32[16,256], index: 1, kind: input, shape index: {}]   ;;  %s280_s2 = inlined_call_operand.hbm [shape: f32[16,256], index: 2, kind: input, shape index: {}]   ;;  %s281_s3 = inlined_call_operand.hbm [shape: f32[1,1], index: 3, kind: output, shape index: {}]  }
   0x1   :  { %9 = vsyncpa [#allocation6], 0 }
   0x2   :  { %10 = vsyncpa [#allocation4], 0  ;;  %s210_s12 = smov [#allocation2]   ;;  %s150_s16 = scalar_lea.hbm %s279_s1, 512 }
   0x3   :  { %s18_s13 = sshll.u32 %s210_s12, 4  ;;  %p151_p0 = scmp.ne.s32.totalorder %s279_s1, %s150_s16  ;;  %s19_s13 = int_to_ptr.vmem [resolvable:$true] %s18_s13 }
   0x4   :  { %p154_p1 = scmp.lt.u32.totalorder %s150_s16, %s279_s1 }
   0x6   :  { %p156_p2 = pnand %p154_p1, %p151_p0 }
   0x8   :  { %159 = shalt.err (!%p156_p2)
}
   0x9   :  { %s160_s21 = scalar_lea.vmem %s19_s13, 512  ;;  %p165_p4 = scmp.lt.s32.totalorder %s19_s13, %s19_s13 }
   0xa   :  { %p161_p3 = scmp.ne.s32.totalorder %s19_s13, %s160_s21  ;;  %p166_p5 = scmp.lt.s32.totalorder %s160_s21, %s160_s21 }
   0xc   :  { %p167_p6 = por %p166_p5, %p165_p4 }
   0xe   :  { %p168_p7 = pnand %p167_p6, %p161_p3 }
  0x10   :  { %171 = shalt.err (!%p168_p7)
}
  0x11   :  { %s211_s22 = smov 256   ;;  %s212_s23 = smov 16  }
  0x12   :  { %24 = dma.hbm_to_vmem [thread:$0]  %s279_s1, 512, %s19_s13, [#allocation3], %s211_s22, %s211_s22, %s212_s23  }
  0x13   :  { %s213_s26 = smov [#allocation5]   ;;  %s172_s30 = scalar_lea.hbm %s280_s2, 512 }
  0x14   :  { %s30_s27 = sshll.u32 %s213_s26, 4  ;;  %p173_p8 = scmp.ne.s32.totalorder %s280_s2, %s172_s30  ;;  %s31_s27 = int_to_ptr.vmem [resolvable:$true] %s30_s27 }
  0x15   :  { %p176_p9 = scmp.lt.u32.totalorder %s172_s30, %s280_s2 }
  0x17   :  { %p178_p10 = pnand %p176_p9, %p173_p8 }
  0x19   :  { %181 = shalt.err (!%p178_p10)
}
  0x1a   :  { %s182_s8 = scalar_lea.vmem %s31_s27, 512  ;;  %p187_p12 = scmp.lt.s32.totalorder %s31_s27, %s31_s27 }
  0x1b   :  { %p183_p11 = scmp.ne.s32.totalorder %s31_s27, %s182_s8  ;;  %p188_p13 = scmp.lt.s32.totalorder %s182_s8, %s182_s8 }
  0x1d   :  { %p189_p0 = por %p188_p13, %p187_p12 }
  0x1f   :  { %p190_p1 = pnand %p189_p0, %p183_p11 }
  0x21   :  { %193 = shalt.err (!%p190_p1)
}
  0x22   :  { %36 = dma.hbm_to_vmem [thread:$0]  %s280_s2, 512, %s31_s27, [#allocation6], %s211_s22, %s211_s22, %s212_s23  }
  0x23   :  { %204 = dma.done.wait [#allocation3], 512  }
  0x24   :  { %205 = vsyncadd [#allocation3], 4294966784 }
  0x25   :  { %206 = dma.done.wait [#allocation6], 512  }
  0x26   :  { %207 = vsyncadd [#allocation6], 4294966784  ;;  %v47_v0 = vld [vmem:[#allocation5] sm:$0xff]  ;;  %v48_v2 = vld [vmem:[#allocation5 + $0x8] sm:$0xff]  ;;  %s194_s15 = scalar_lea.hbm %s281_s3, 16 }
  0x27   :  { %v43_v1 = vld [vmem:[#allocation2] sm:$0xff]  ;;  %vm51_vm0 = vcmp.lt.f32.partialorder %v47_v0, 1.0  ;;  %vm59_vm1 = vcmp.lt.f32.partialorder %v47_v0, 0.625  ;;  %vm67_vm2 = vcmp.lt.f32.partialorder %v47_v0, 0.5  ;;  %vm75_vm3 = vcmp.lt.f32.partialorder %v47_v0, 0.375  ;;  %v44_v3 = vld [vmem:[#allocation2 + $0x8] sm:$0xff]  ;;  %p195_p2 = scmp.ne.s32.totalorder %s281_s3, %s194_s15  ;;  %p198_p3 = scmp.lt.u32.totalorder %s194_s15, %s281_s3 }
  0x28   :  { %vm52_vm4 = vcmp.lt.f32.partialorder %v48_v2, 1.0  ;;  %v55_v4 = vsel %vm51_vm0, 30.0, %v47_v0  ;;  %vm60_vm5 = vcmp.lt.f32.partialorder %v48_v2, 0.625  ;;  %vm68_vm6 = vcmp.lt.f32.partialorder %v48_v2, 0.5  ;;  %v49_v5 = vld [vmem:[#allocation5 + $0x10] sm:$0xff]  ;;  %v50_v8 = vld [vmem:[#allocation5 + $0x18] sm:$0xff] }
  0x29   :  { %v56_v6 = vsel %vm52_vm4, 30.0, %v48_v2  ;;  %v63_v7 = vsel %vm59_vm1, 10.0, %v55_v4  ;;  %vm76_vm7 = vcmp.lt.f32.partialorder %v48_v2, 0.375  ;;  %vm83_vm8 = vcmp.lt.f32.partialorder %v47_v0, 0.25  ;;  %v45_v24 = vld [vmem:[#allocation2 + $0x10] sm:$0xff]  ;;  %v46_v25 = vld [vmem:[#allocation2 + $0x18] sm:$0xff]  ;;  %p200_p4 = pnand %p198_p3, %p195_p2 }
  0x2a   :  { %v64_v9 = vsel %vm60_vm5, 10.0, %v56_v6  ;;  %v71_v10 = vsel %vm67_vm2, 5.0, %v63_v7  ;;  %vm84_vm9 = vcmp.lt.f32.partialorder %v48_v2, 0.25  ;;  %v91_v11 = vsub.f32 %v43_v1, %v47_v0  ;;  %v109_v43 = vld [vmem:[%s278_s0] sm:$0xff]  ;;  %v110_v44 = vld [vmem:[%s278_s0 + $0x8] sm:$0xff] }
  0x2b   :  { %v72_v12 = vsel %vm68_vm6, 5.0, %v64_v9  ;;  %v79_v13 = vsel %vm75_vm3, 2.0, %v71_v10  ;;  %v92_v14 = vsub.f32 %v44_v3, %v48_v2  ;;  %vm53_vm10 = vcmp.lt.f32.partialorder %v49_v5, 1.0 }
  0x2c   :  { %v80_v15 = vsel %vm76_vm7, 2.0, %v72_v12  ;;  %v87_v16 = vsel %vm83_vm8, 1.0, %v79_v13  ;;  %v95_v17 = vand.u32 2147483647, %v91_v11  ;;  %vm54_vm11 = vcmp.lt.f32.partialorder %v50_v8, 1.0 }
  0x2d   :  { %v88_v18 = vsel %vm84_vm9, 1.0, %v80_v15  ;;  %v96_v19 = vand.u32 2147483647, %v92_v14  ;;  %v57_v20 = vsel %vm53_vm10, 30.0, %v49_v5  ;;  %v58_v21 = vsel %vm54_vm11, 30.0, %v50_v8 }
  0x2e   :  { %v99_v22 = vmul.f32 %v95_v17, %v87_v16  ;;  %vm61_vm12 = vcmp.lt.f32.partialorder %v49_v5, 0.625  ;;  %vm62_vm13 = vcmp.lt.f32.partialorder %v50_v8, 0.625  ;;  %vm69_vm14 = vcmp.lt.f32.partialorder %v49_v5, 0.5 }
  0x2f   :  { %v100_v23 = vmul.f32 %v96_v19, %v88_v18  ;;  %v65_v26 = vsel %vm61_vm12, 10.0, %v57_v20  ;;  %v66_v27 = vsel %vm62_vm13, 10.0, %v58_v21  ;;  %vm70_vm15 = vcmp.lt.f32.partialorder %v50_v8, 0.5 }
  0x30   :  { %v73_v28 = vsel %vm69_vm14, 5.0, %v65_v26  ;;  %v74_v29 = vsel %vm70_vm15, 5.0, %v66_v27  ;;  %vm77_vm0 = vcmp.lt.f32.partialorder %v49_v5, 0.375  ;;  %vm78_vm1 = vcmp.lt.f32.partialorder %v50_v8, 0.375 }
  0x31   :  { %v103_v30 = vadd.f32 %v100_v23, %v99_v22  ;;  %v81_v31 = vsel %vm77_vm0, 2.0, %v73_v28  ;;  %v82_v32 = vsel %vm78_vm1, 2.0, %v74_v29  ;;  %vm85_vm2 = vcmp.lt.f32.partialorder %v49_v5, 0.25 }
  0x32   :  { %vm86_vm3 = vcmp.lt.f32.partialorder %v50_v8, 0.25  ;;  %v93_v33 = vsub.f32 %v45_v24, %v49_v5  ;;  %v94_v34 = vsub.f32 %v46_v25, %v50_v8  ;;  %v89_v35 = vsel %vm85_vm2, 1.0, %v81_v31 }
  0x33   :  { %104 = vadd.xlane.f32.xlu0 %v103_v30  ;;  %v90_v36 = vsel %vm86_vm3, 1.0, %v82_v32  ;;  %vm113_vm4 = vcmask 7168  }
  0x34   :  { %v97_v37 = vand.u32 2147483647, %v93_v33  ;;  %v98_v38 = vand.u32 2147483647, %v94_v34 }
  0x36   :  { %v101_v39 = vmul.f32 %v97_v37, %v89_v35  ;;  %v102_v40 = vmul.f32 %v98_v38, %v90_v36 }
  0x38   :  { %v106_v41 = vadd.f32 %v102_v40, %v101_v39 }
  0x3a   :  { %107 = vadd.xlane.f32.xlu0 %v106_v41 }
  0xc0   :  { %v105_v42 = vpop.xlane.xlu0 %104 }
  0xc1   :  { %v111_v45 = vmul.f32 %v109_v43, %v105_v42 }
  0xc3   :  { %v114_v48 = vsel %vm113_vm4, %v111_v45, 0.0 }
  0xc7   :  { %v108_v46 = vpop.xlane.xlu0 %107 }
  0xc8   :  { %v112_v47 = vmul.f32 %v110_v44, %v108_v46 }
  0xca   :  { %v115_v49 = vsel %vm113_vm4, %v112_v47, 0.0 }
  0xcb   :  { %v116_v50 = vadd.f32 %v115_v49, %v114_v48 }
  0xcd   :  { %117 = vadd.xlane.f32.xlu1 %v116_v50 }
 0x15a   :  { %v118_v51 = vpop.xlane.xlu1 %117 }
 0x15b   :  { %v119_v52 = vrot.slane %v118_v51, 4 }
 0x15d   :  { %v120_v53 = vadd.f32 %v119_v52, %v118_v51 }
 0x15f   :  { %v121_v54 = vrot.slane %v120_v53, 2 }
 0x161   :  { %v122_v55 = vadd.f32 %v121_v54, %v120_v53 }
 0x163   :  { %v123_v56 = vrot.slane %v122_v55, 1 }
 0x165   :  { %v124_v57 = vadd.f32 %v123_v56, %v122_v55 }
 0x167   :  { %143 = vpush %v124_v57 }
 0x198   :  { %s144_s13 = spop %143 }
 0x199   :  { %127 = sst [smem:[#allocation7]] %s144_s13 }
 0x19a   :  { %203 = shalt.err (!%p200_p4)
}
 0x19b   :  { %s214_s20 = smov [#allocation7]  }
 0x19c   :  { %135 = dma.smem_to_hbm %s214_s20, 16, %s281_s3, [#allocation4]  }
 0x19d   :  { %208 = dma.done.wait [#allocation4], 16  }
 0x19e   :  { %209 = vsyncadd [#allocation4], 4294967280 }
 0x19f   :  { %139 = sfence }
 0x1a0   :  { %140 = vsyncpa [#allocation3], 1 }
 0x1a1   :  { %141 = vsyncpa [#allocation6], 1 }
 0x1a2   :  { %142 = vsyncpa [#allocation4], 1 }

</bundles_post_ra>
